<compile_context>
chip_gen: v7x
topology: tpu7x:2x2x1
jax: 0.10.0
libtpu: 0.0.40
codegen_flags: <defaults>
</compile_context>

<pallas_src>
import functools

import jax
import jax.numpy as jnp
from jax.experimental import pallas as pl
from jax.experimental.pallas import tpu as pltpu

LN_EPS = 1e-5  # torch.nn.LayerNorm default


def _round_up(x, m):
    return ((x + m - 1) // m) * m


def ffn_kernel(x_ref, w1_ref, b1_ref, w2_ref, b2_ref, gamma_ref, beta_ref,
               o_ref, *, d_true, mm_dtype):
    # x_ref: (tm, Dp) f32 tile of the flattened, padded (rows_p, Dp) input.
    x = x_ref[...]

    # layer_1: Conv1d(D, D_inner, 1)  ==  x @ W1 + b1  (w1 stored as (Dp, Dip))
    h = jnp.dot(x.astype(mm_dtype), w1_ref[...],
                preferred_element_type=jnp.float32) + b1_ref[...]
    h = jnp.maximum(h, 0.0)  # ReLU

    # layer_2: Conv1d(D_inner, D, 1)
    y = jnp.dot(h.astype(mm_dtype), w2_ref[...],
                preferred_element_type=jnp.float32) + b2_ref[...]

    # dropout: identity (inference); residual add in f32.
    z = y + x

    # LayerNorm over the true last dim (biased variance, eps=1e-5).  Padded
    # columns of z are exactly zero (zero-padded x, w1/w2 rows/cols, biases),
    # but they must be masked out of the centered statistics.
    d_pad = z.shape[-1]
    if d_true == d_pad:
        mean = jnp.mean(z, axis=-1, keepdims=True)
        diff = z - mean
    else:
        col = jax.lax.broadcasted_iota(jnp.int32, z.shape, 1)
        valid = (col < d_true).astype(jnp.float32)
        mean = jnp.sum(z * valid, axis=-1, keepdims=True) * (1.0 / d_true)
        diff = (z - mean) * valid
    var = jnp.sum(diff * diff, axis=-1, keepdims=True) * (1.0 / d_true)
    zn = diff * jax.lax.rsqrt(var + LN_EPS)
    o_ref[...] = zn * gamma_ref[...] + beta_ref[...]


def positionwise_ffn(x, w1, b1, w2, b2, gamma, beta, *, tm=256, use_bf16=True):
    """x: (B, S, D); w1: (D, D_inner); w2: (D_inner, D); b1: (1, D_inner);
    b2/gamma/beta: (1, D). Returns (B, S, D) float32."""
    B, S, D = x.shape
    D_inner = w1.shape[1]
    rows = B * S

    # Lane-dense padding of the channel dims; sublane-aligned row tile.
    Dp = _round_up(D, 128)
    Dip = _round_up(D_inner, 128)
    tm_eff = min(tm, _round_up(rows, 8))
    rows_p = _round_up(rows, tm_eff)

    mm_dtype = jnp.bfloat16 if use_bf16 else jnp.float32

    x2d = x.reshape(rows, D).astype(jnp.float32)
    x2d = jnp.pad(x2d, ((0, rows_p - rows), (0, Dp - D)))
    w1p = jnp.pad(w1.astype(jnp.float32),
                  ((0, Dp - D), (0, Dip - D_inner))).astype(mm_dtype)
    w2p = jnp.pad(w2.astype(jnp.float32),
                  ((0, Dip - D_inner), (0, Dp - D))).astype(mm_dtype)
    b1p = jnp.pad(b1.astype(jnp.float32), ((0, 0), (0, Dip - D_inner)))
    b2p = jnp.pad(b2.astype(jnp.float32), ((0, 0), (0, Dp - D)))
    gp = jnp.pad(gamma.astype(jnp.float32), ((0, 0), (0, Dp - D)))
    bp = jnp.pad(beta.astype(jnp.float32), ((0, 0), (0, Dp - D)))

    grid = (rows_p // tm_eff,)

    # VMEM budget: tiles are double-buffered by default; weights are resident.
    w_item = 2 if use_bf16 else 4
    vmem_need = (
        2 * 2 * (tm_eff * Dp * 4)            # x-in + out tiles, double-buffered
        + 2 * 2 * (Dp * Dip * w_item)        # w1 + w2 (default double-buffered)
        + tm_eff * Dip * 4                   # h intermediate
        + 8 * (Dip + 3 * Dp) * 4             # biases / gamma / beta
    )
    vmem_limit = int(min(max(2 * vmem_need, 32 * 1024 * 1024),
                         64 * 1024 * 1024))  # cap: v7x has 64 MiB physical VMEM

    cost = pl.CostEstimate(
        flops=4 * rows_p * Dp * Dip,         # two matmuls, 2 flops/MAC
        transcendentals=rows_p,              # one rsqrt per row
        bytes_accessed=(rows_p * Dp * 4      # x in
                        + rows_p * Dp * 4    # out
                        + 2 * Dp * Dip * w_item),  # weights
    )

    kernel = functools.partial(ffn_kernel, d_true=D, mm_dtype=mm_dtype)

    out = pl.pallas_call(
        kernel,
        out_shape=jax.ShapeDtypeStruct((rows_p, Dp), jnp.float32),
        grid_spec=pltpu.PrefetchScalarGridSpec(
            num_scalar_prefetch=0,
            grid=grid,
            in_specs=[
                pl.BlockSpec((tm_eff, Dp), lambda i: (i, 0)),   # x tile
                pl.BlockSpec((Dp, Dip), lambda i: (0, 0)),      # w1 (invariant)
                pl.BlockSpec((1, Dip), lambda i: (0, 0)),       # b1
                pl.BlockSpec((Dip, Dp), lambda i: (0, 0)),      # w2 (invariant)
                pl.BlockSpec((1, Dp), lambda i: (0, 0)),        # b2
                pl.BlockSpec((1, Dp), lambda i: (0, 0)),        # gamma
                pl.BlockSpec((1, Dp), lambda i: (0, 0)),        # beta
            ],
            out_specs=pl.BlockSpec((tm_eff, Dp), lambda i: (i, 0)),
        ),
        compiler_params=pltpu.CompilerParams(
            dimension_semantics=("parallel",),
            vmem_limit_bytes=vmem_limit,
        ),
        cost_estimate=cost,
    )(x2d, w1p, b1p, w2p, b2p, gp, bp)

    return out[:rows, :D].reshape(B, S, D)


def reference(x, w1, b1, w2, b2, gamma, beta):
    h = jnp.maximum(jnp.einsum("bsd,dk->bsk", x, w1) + b1, 0.0)
    y = jnp.einsum("bsk,kd->bsd", h, w2) + b2
    z = y + x
    mean = jnp.mean(z, axis=-1, keepdims=True)
    var = jnp.mean((z - mean) ** 2, axis=-1, keepdims=True)
    return (z - mean) * jax.lax.rsqrt(var + LN_EPS) * gamma + beta


if __name__ == "__main__":
    B, S = 2, 8
    dim_hidden, dim_inner_hidden = 32, 64

    key = jax.random.PRNGKey(0)
    kx, k1, kb1, k2, kb2 = jax.random.split(key, 5)

    x = jax.random.normal(kx, (B, S, dim_hidden), dtype=jnp.float32)

    # Conv1d(dim_hidden, dim_inner_hidden, 1): weight (D_inner, D, 1) -> (D, D_inner)
    w1 = jax.random.normal(k1, (dim_hidden, dim_inner_hidden), jnp.float32) * 0.1
    b1 = jax.random.normal(kb1, (1, dim_inner_hidden), jnp.float32) * 0.1
    # Conv1d(dim_inner_hidden, dim_hidden, 1): weight (D, D_inner, 1) -> (D_inner, D)
    w2 = jax.random.normal(k2, (dim_inner_hidden, dim_hidden), jnp.float32) * 0.1
    b2 = jax.random.normal(kb2, (1, dim_hidden), jnp.float32) * 0.1
    # LayerNorm(dim_hidden) params (torch default init)
    gamma = jnp.ones((1, dim_hidden), jnp.float32)
    beta = jnp.zeros((1, dim_hidden), jnp.float32)

    out = positionwise_ffn(x, w1, b1, w2, b2, gamma, beta)
    out = jax.block_until_ready(out)

    ref = reference(x, w1, b1, w2, b2, gamma, beta)
    assert out.shape == (B, S, dim_hidden)
    # bf16 matmul inputs with f32 accumulation -> slightly wider tolerance.
    assert jnp.allclose(out, ref, atol=3e-2, rtol=3e-2), (
        float(jnp.max(jnp.abs(out - ref))))

    print("KERNEL_OK")
</pallas_src>

<mosaic_0001>
module attributes {stable_mosaic.version = 11 : i64} {
  func.func @ffn_kernel(%arg0: i32, %arg1: memref<16x128xf32, #tpu.memory_space<vmem>>, %arg2: memref<128x128xbf16, #tpu.memory_space<vmem>>, %arg3: memref<1x128xf32, #tpu.memory_space<vmem>>, %arg4: memref<128x128xbf16, #tpu.memory_space<vmem>>, %arg5: memref<1x128xf32, #tpu.memory_space<vmem>>, %arg6: memref<1x128xf32, #tpu.memory_space<vmem>>, %arg7: memref<1x128xf32, #tpu.memory_space<vmem>>, %arg8: memref<16x128xf32, #tpu.memory_space<vmem>>) attributes {dimension_semantics = [#tpu.dimension_semantics<parallel>], iteration_bounds = array<i64: 1>, scalar_prefetch = 0 : i64, scratch_operands = 0 : i64, tpu.core_type = #tpu.core_type<tc>, window_params = [{transform_indices = @transform_0, window_bounds = array<i64: 16, 128>}, {pipeline_mode = #tpu.pipeline_mode<synchronous>, transform_indices = @transform_1, window_bounds = array<i64: 128, 128>}, {pipeline_mode = #tpu.pipeline_mode<synchronous>, transform_indices = @transform_2, window_bounds = array<i64: 1, 128>}, {pipeline_mode = #tpu.pipeline_mode<synchronous>, transform_indices = @transform_3, window_bounds = array<i64: 128, 128>}, {pipeline_mode = #tpu.pipeline_mode<synchronous>, transform_indices = @transform_4, window_bounds = array<i64: 1, 128>}, {pipeline_mode = #tpu.pipeline_mode<synchronous>, transform_indices = @transform_5, window_bounds = array<i64: 1, 128>}, {pipeline_mode = #tpu.pipeline_mode<synchronous>, transform_indices = @transform_6, window_bounds = array<i64: 1, 128>}, {transform_indices = @transform_7, window_bounds = array<i64: 16, 128>}]} {
    %c0 = arith.constant 0 : index
    %c0_0 = arith.constant 0 : index
    %0 = vector.load %arg1[%c0, %c0_0] : memref<16x128xf32, #tpu.memory_space<vmem>>, vector<16x128xf32>
    %1 = arith.truncf %0 : vector<16x128xf32> to vector<16x128xbf16>
    %c0_1 = arith.constant 0 : index
    %c0_2 = arith.constant 0 : index
    %2 = vector.load %arg2[%c0_1, %c0_2] : memref<128x128xbf16, #tpu.memory_space<vmem>>, vector<128x128xbf16>
    %cst = arith.constant dense<0.000000e+00> : vector<16x128xf32>
    %3 = tpu.matmul %1, %2, %cst {dimension_numbers = #tpu.dot_dimension_numbers<[1], [0], [0], [1], [0, 0, 1, 1], [], []>} : vector<16x128xbf16>, vector<128x128xbf16>, vector<16x128xf32> -> vector<16x128xf32>
    %c0_3 = arith.constant 0 : index
    %c0_4 = arith.constant 0 : index
    %4 = vector.load %arg3[%c0_3, %c0_4] : memref<1x128xf32, #tpu.memory_space<vmem>>, vector<1x128xf32>
    %5 = vector.broadcast %4 : vector<1x128xf32> to vector<16x128xf32>
    %6 = arith.addf %3, %5 : vector<16x128xf32>
    %cst_5 = arith.constant 0.000000e+00 : f32
    %7 = vector.broadcast %cst_5 : f32 to vector<16x128xf32>
    %8 = arith.maximumf %6, %7 : vector<16x128xf32>
    %9 = arith.truncf %8 : vector<16x128xf32> to vector<16x128xbf16>
    %c0_6 = arith.constant 0 : index
    %c0_7 = arith.constant 0 : index
    %10 = vector.load %arg4[%c0_6, %c0_7] : memref<128x128xbf16, #tpu.memory_space<vmem>>, vector<128x128xbf16>
    %cst_8 = arith.constant dense<0.000000e+00> : vector<16x128xf32>
    %11 = tpu.matmul %9, %10, %cst_8 {dimension_numbers = #tpu.dot_dimension_numbers<[1], [0], [0], [1], [0, 0, 1, 1], [], []>} : vector<16x128xbf16>, vector<128x128xbf16>, vector<16x128xf32> -> vector<16x128xf32>
    %c0_9 = arith.constant 0 : index
    %c0_10 = arith.constant 0 : index
    %12 = vector.load %arg5[%c0_9, %c0_10] : memref<1x128xf32, #tpu.memory_space<vmem>>, vector<1x128xf32>
    %13 = vector.broadcast %12 : vector<1x128xf32> to vector<16x128xf32>
    %14 = arith.addf %11, %13 : vector<16x128xf32>
    %15 = arith.addf %14, %0 : vector<16x128xf32>
    %16 = tpu.iota {dimensions = array<i32: 1>} : vector<16x128xi32>
    %c32_i32 = arith.constant 32 : i32
    %17 = vector.broadcast %c32_i32 : i32 to vector<16x128xi32>
    %18 = arith.cmpi slt, %16, %17 : vector<16x128xi32>
    %19 = arith.extui %18 : vector<16x128xi1> to vector<16x128xi32>
    %20 = arith.sitofp %19 : vector<16x128xi32> to vector<16x128xf32>
    %21 = arith.mulf %15, %20 : vector<16x128xf32>
    %cst_11 = arith.constant dense<0.000000e+00> : vector<16xf32>
    %22 = vector.multi_reduction <add>, %21, %cst_11 [1] : vector<16x128xf32> to vector<16xf32>
    %23 = vector.shape_cast %22 : vector<16xf32> to vector<16x1xf32>
    %cst_12 = arith.constant 3.125000e-02 : f32
    %24 = vector.broadcast %cst_12 : f32 to vector<16x1xf32>
    %25 = arith.mulf %23, %24 : vector<16x1xf32>
    %26 = vector.broadcast %25 : vector<16x1xf32> to vector<16x128xf32>
    %27 = arith.subf %15, %26 : vector<16x128xf32>
    %28 = arith.mulf %27, %20 : vector<16x128xf32>
    %29 = arith.mulf %28, %28 : vector<16x128xf32>
    %cst_13 = arith.constant dense<0.000000e+00> : vector<16xf32>
    %30 = vector.multi_reduction <add>, %29, %cst_13 [1] : vector<16x128xf32> to vector<16xf32>
    %31 = vector.shape_cast %30 : vector<16xf32> to vector<16x1xf32>
    %cst_14 = arith.constant 3.125000e-02 : f32
    %32 = vector.broadcast %cst_14 : f32 to vector<16x1xf32>
    %33 = arith.mulf %31, %32 : vector<16x1xf32>
    %cst_15 = arith.constant 9.99999974E-6 : f32
    %34 = vector.broadcast %cst_15 : f32 to vector<16x1xf32>
    %35 = arith.addf %33, %34 : vector<16x1xf32>
    %36 = math.rsqrt %35 : vector<16x1xf32>
    %37 = vector.broadcast %36 : vector<16x1xf32> to vector<16x128xf32>
    %38 = arith.mulf %28, %37 : vector<16x128xf32>
    %c0_16 = arith.constant 0 : index
    %c0_17 = arith.constant 0 : index
    %39 = vector.load %arg6[%c0_16, %c0_17] : memref<1x128xf32, #tpu.memory_space<vmem>>, vector<1x128xf32>
    %40 = vector.broadcast %39 : vector<1x128xf32> to vector<16x128xf32>
    %41 = arith.mulf %38, %40 : vector<16x128xf32>
    %c0_18 = arith.constant 0 : index
    %c0_19 = arith.constant 0 : index
    %42 = vector.load %arg7[%c0_18, %c0_19] : memref<1x128xf32, #tpu.memory_space<vmem>>, vector<1x128xf32>
    %43 = vector.broadcast %42 : vector<1x128xf32> to vector<16x128xf32>
    %44 = arith.addf %41, %43 : vector<16x128xf32>
    %c0_20 = arith.constant 0 : index
    %c0_21 = arith.constant 0 : index
    %45 = vector.load %arg8[%c0_20, %c0_21] : memref<16x128xf32, #tpu.memory_space<vmem>>, vector<16x128xf32>
    tpu.vector_store %arg8[%c0_20, %c0_21], %44 {strides = array<i32>} : memref<16x128xf32, #tpu.memory_space<vmem>>, vector<16x128xf32>,
    return
  }
  func.func @transform_0(%arg0: i32) -> (i32, i32) {
    %c0_i32 = arith.constant 0 : i32
    %c0_i32_0 = arith.constant 0 : i32
    return %arg0, %c0_i32 : i32, i32
  }
  func.func @transform_1(%arg0: i32) -> (i32, i32) {
    %c0_i32 = arith.constant 0 : i32
    %c0_i32_0 = arith.constant 0 : i32
    %c0_i32_1 = arith.constant 0 : i32
    return %c0_i32, %c0_i32_0 : i32, i32
  }
  func.func @transform_2(%arg0: i32) -> (i32, i32) {
    %c0_i32 = arith.constant 0 : i32
    %c0_i32_0 = arith.constant 0 : i32
    %c0_i32_1 = arith.constant 0 : i32
    return %c0_i32, %c0_i32_0 : i32, i32
  }
  func.func @transform_3(%arg0: i32) -> (i32, i32) {
    %c0_i32 = arith.constant 0 : i32
    %c0_i32_0 = arith.constant 0 : i32
    %c0_i32_1 = arith.constant 0 : i32
    return %c0_i32, %c0_i32_0 : i32, i32
  }
  func.func @transform_4(%arg0: i32) -> (i32, i32) {
    %c0_i32 = arith.constant 0 : i32
    %c0_i32_0 = arith.constant 0 : i32
    %c0_i32_1 = arith.constant 0 : i32
    return %c0_i32, %c0_i32_0 : i32, i32
  }
  func.func @transform_5(%arg0: i32) -> (i32, i32) {
    %c0_i32 = arith.constant 0 : i32
    %c0_i32_0 = arith.constant 0 : i32
    %c0_i32_1 = arith.constant 0 : i32
    return %c0_i32, %c0_i32_0 : i32, i32
  }
  func.func @transform_6(%arg0: i32) -> (i32, i32) {
    %c0_i32 = arith.constant 0 : i32
    %c0_i32_0 = arith.constant 0 : i32
    %c0_i32_1 = arith.constant 0 : i32
    return %c0_i32, %c0_i32_0 : i32, i32
  }
  func.func @transform_7(%arg0: i32) -> (i32, i32) {
    %c0_i32 = arith.constant 0 : i32
    %c0_i32_0 = arith.constant 0 : i32
    return %arg0, %c0_i32 : i32, i32
  }
}

</mosaic_0001>

<bundles_post_ra>
// kernel: tpu_custom_call.1
= control target key start
LH: loop header
LB: loop body
LE: loop exit
PB: predicated region body
PF: predicated region fallthrough
CT: control target
= control target key end

     0   :  { %12 = vsyncpa [#allocation3], 0  ;;  %s714_s0 = inlined_call_operand.hbm [shape: f32[16,128], index: 0, kind: input, shape index: {}]   ;;  %s715_s1 = inlined_call_operand.hbm [shape: bf16[128,128], index: 1, kind: input, shape index: {}]   ;;  %s716_s2 = inlined_call_operand.vmem [shape: f32[1,128], index: 2, kind: input, shape index: {}]   ;;  %s717_s3 = inlined_call_operand.hbm [shape: bf16[128,128], index: 3, kind: input, shape index: {}]   ;;  %s718_s4 = inlined_call_operand.vmem [shape: f32[1,128], index: 4, kind: input, shape index: {}]   ;;  %s719_s5 = inlined_call_operand.vmem [shape: f32[1,128], index: 5, kind: input, shape index: {}]   ;;  %s720_s6 = inlined_call_operand.vmem [shape: f32[1,128], index: 6, kind: input, shape index: {}]   ;;  %s721_s7 = inlined_call_operand.hbm [shape: f32[16,128], index: 7, kind: output, shape index: {}]  }
   0x1   :  { %13 = vsyncpa [#allocation6], 0 }
   0x2   :  { %14 = vsyncpa [#allocation4], 0  ;;  %s573_s24 = smov [#allocation5]   ;;  %s479_s28 = scalar_lea.hbm %s715_s1, 1024 }
   0x3   :  { %s32_s25 = sshll.u32 %s573_s24, 4  ;;  %p480_p0 = scmp.ne.s32.totalorder %s715_s1, %s479_s28  ;;  %s33_s25 = int_to_ptr.vmem [resolvable:$true] %s32_s25 }
   0x4   :  { %p483_p1 = scmp.lt.u32.totalorder %s479_s28, %s715_s1 }
   0x6   :  { %p485_p2 = pnand %p483_p1, %p480_p0 }
   0x8   :  { %488 = shalt.err (!%p485_p2)
}
   0x9   :  { %s489_s10 = scalar_lea.vmem %s33_s25, 1024  ;;  %p494_p4 = scmp.lt.s32.totalorder %s33_s25, %s33_s25 }
   0xa   :  { %p490_p3 = scmp.ne.s32.totalorder %s33_s25, %s489_s10  ;;  %p495_p5 = scmp.lt.s32.totalorder %s489_s10, %s489_s10 }
   0xc   :  { %p496_p6 = por %p495_p5, %p494_p4 }
   0xe   :  { %p497_p7 = pnand %p496_p6, %p490_p3 }
  0x10   :  { %500 = shalt.err (!%p497_p7)
}
  0x11   :  { %s574_s11 = smov 64   ;;  %s575_s12 = smov 4  }
  0x12   :  { %38 = dma.hbm_to_vmem [thread:$0]  %s715_s1, 1024, %s33_s25, [#allocation6], %s574_s11, %s574_s11, %s575_s12  }
  0x13   :  { %s576_s15 = smov [#allocation2]   ;;  %s501_s19 = scalar_lea.hbm %s714_s0, 256 }
  0x14   :  { %s20_s16 = sshll.u32 %s576_s15, 4  ;;  %p502_p8 = scmp.ne.s32.totalorder %s714_s0, %s501_s19  ;;  %s21_s16 = int_to_ptr.vmem [resolvable:$true] %s20_s16 }
  0x15   :  { %p505_p9 = scmp.lt.u32.totalorder %s501_s19, %s714_s0 }
  0x17   :  { %p507_p10 = pnand %p505_p9, %p502_p8 }
  0x19   :  { %510 = shalt.err (!%p507_p10)
}
  0x1a   :  { %s511_s24 = scalar_lea.vmem %s21_s16, 256  ;;  %p516_p12 = scmp.lt.s32.totalorder %s21_s16, %s21_s16 }
  0x1b   :  { %p512_p11 = scmp.ne.s32.totalorder %s21_s16, %s511_s24  ;;  %p517_p13 = scmp.lt.s32.totalorder %s511_s24, %s511_s24 }
  0x1d   :  { %p518_p0 = por %p517_p13, %p516_p12 }
  0x1f   :  { %p519_p1 = pnand %p518_p0, %p512_p11 }
  0x21   :  { %522 = shalt.err (!%p519_p1)
}
  0x22   :  { %s577_s1 = smov 128   ;;  %s578_s25 = smov 8  }
  0x23   :  { %26 = dma.hbm_to_vmem [thread:$0]  %s714_s0, 256, %s21_s16, [#allocation3], %s577_s1, %s577_s1, %s578_s25  }
  0x24   :  { %s579_s28 = smov [#allocation7]   ;;  %s523_s9 = scalar_lea.hbm %s717_s3, 1024 }
  0x25   :  { %s46_s29 = sshll.u32 %s579_s28, 4  ;;  %p524_p2 = scmp.ne.s32.totalorder %s717_s3, %s523_s9  ;;  %s47_s29 = int_to_ptr.vmem [resolvable:$true] %s46_s29 }
  0x26   :  { %p527_p3 = scmp.lt.u32.totalorder %s523_s9, %s717_s3 }
  0x28   :  { %p529_p4 = pnand %p527_p3, %p524_p2 }
  0x2a   :  { %532 = shalt.err (!%p529_p4)
}
  0x2b   :  { %s533_s17 = scalar_lea.vmem %s47_s29, 1024  ;;  %p538_p6 = scmp.lt.s32.totalorder %s47_s29, %s47_s29 }
  0x2c   :  { %p534_p5 = scmp.ne.s32.totalorder %s47_s29, %s533_s17  ;;  %p539_p7 = scmp.lt.s32.totalorder %s533_s17, %s533_s17 }
  0x2e   :  { %p540_p8 = por %p539_p7, %p538_p6 }
  0x30   :  { %p541_p9 = pnand %p540_p8, %p534_p5 }
  0x32   :  { %544 = shalt.err (!%p541_p9)
}
  0x33   :  { %52 = dma.hbm_to_vmem [thread:$0]  %s717_s3, 1024, %s47_s29, [#allocation6], %s574_s11, %s574_s11, %s575_s12  }
  0x34   :  { %567 = dma.done.wait [#allocation3], 256  }
  0x35   :  { %568 = vsyncadd [#allocation3], 4294967040 }
  0x36   :  { %569 = dma.done.wait [#allocation6], 2048  }
  0x37   :  { %570 = vsyncadd [#allocation6], 4294965248  ;;  %v580_v0 = vmov 0.0   ;;  %vm581_vm0 = vmmov 0   ;;  %v459_v1 = vld [vmem:[#allocation5] sm:$0xff]   ;;  %v460_v2 = vld [vmem:[#allocation5 + $0x8] sm:$0xff]   ;;  %v301_v30 = vlaneseq }
  0x38   :  { %409 = vmatprep.subr.bf16.mxu0 %v580_v0  ;;  %425 = vmatprep.mubr.msk.bf16.mxu0 %vm581_vm0, %v580_v0  ;;  %v461_v3 = vld [vmem:[#allocation5 + $0x10] sm:$0xff]   ;;  %v467_v4 = vld [vmem:[#allocation7] sm:$0xff]   ;;  %v462_v5 = vld [vmem:[#allocation5 + $0x18] sm:$0xff]   ;;  %s582_s21 = smov [#allocation8]  }
  0x39   :  { %429 = vmatprep.subr.bf16.mxu1 %v580_v0  ;;  %445 = vmatprep.mubr.msk.bf16.mxu1 %vm581_vm0, %v580_v0  ;;  %v468_v6 = vld [vmem:[#allocation7 + $0x8] sm:$0xff]   ;;  %v463_v7 = vld [vmem:[#allocation5 + $0x20] sm:$0xff]   ;;  %v469_v8 = vld [vmem:[#allocation7 + $0x10] sm:$0xff]   ;;  %v302_v31 = vand.u32 127, %v301_v30  ;;  %s357_s22 = sshll.u32 %s582_s21, 4  ;;  %s358_s22 = int_to_ptr.vmem [resolvable:$true] %s357_s22 }
  0x3a   :  { %410 = vmatpush3.bf16.msra.mxu0 %v459_v1  ;;  %430 = vmatpush3.bf16.msra.mxu1 %v467_v4  ;;  %v464_v9 = vld [vmem:[#allocation5 + $0x28] sm:$0xff]   ;;  %v470_v10 = vld [vmem:[#allocation7 + $0x18] sm:$0xff]   ;;  %v465_v11 = vld [vmem:[#allocation5 + $0x30] sm:$0xff]   ;;  %s545_s23 = scalar_lea.vmem %s358_s22, 256  ;;  %p550_p11 = scmp.lt.s32.totalorder %s358_s22, %s358_s22 }
  0x3b   :  { %411 = vmatprep.subr.bf16.mxu0 %v580_v0  ;;  %431 = vmatprep.subr.bf16.mxu1 %v580_v0  ;;  %v471_v12 = vld [vmem:[#allocation7 + $0x20] sm:$0xff]   ;;  %v466_v13 = vld [vmem:[#allocation5 + $0x38] sm:$0xff]   ;;  %v69_v14 = vld [vmem:[#allocation2] sm:$0xff]  ;;  %vm303_vm1 = vcmp.lt.s32.totalorder %v302_v31, 32  ;;  %p546_p10 = scmp.ne.s32.totalorder %s358_s22, %s545_s23  ;;  %p551_p12 = scmp.lt.s32.totalorder %s545_s23, %s545_s23 }
  0x3c   :  { %v70_v15 = vld [vmem:[#allocation2 + $0x8] sm:$0xff]  ;;  %v472_v16 = vld [vmem:[#allocation7 + $0x28] sm:$0xff]   ;;  %v473_v18 = vld [vmem:[#allocation7 + $0x30] sm:$0xff]   ;;  %v388_v37 = vsel %vm303_vm1, 1.0, %v580_v0 }
  0x3d   :  { %v71_v17 = vpack.c.bf16 %v70_v15, %v69_v14  ;;  %v474_v19 = vld [vmem:[#allocation7 + $0x38] sm:$0xff]   ;;  %v370_v20 = vld [vmem:[%s716_s2] ss:$0 sm:$0xff]  ;;  %p552_p13 = por %p551_p12, %p550_p11 }
  0x3e   :  { %412 = vmatpush3.bf16.msra.mxu0 %v460_v2  ;;  %432 = vmatpush3.bf16.msra.mxu1 %v468_v6  ;;  %v379_v32 = vld [vmem:[%s718_s4] ss:$0 sm:$0xff] }
  0x3f   :  { %413 = vmatprep.subr.bf16.mxu0 %v580_v0  ;;  %433 = vmatprep.subr.bf16.mxu1 %v580_v0  ;;  %v389_v61 = vld [vmem:[%s719_s5] ss:$0 sm:$0xff]  ;;  %p553_p0 = pnand %p552_p13, %p546_p10 }
  0x40   :  { %v390_v63 = vld [vmem:[%s720_s6] ss:$0 sm:$0xff] }
  0x42   :  { %414 = vmatpush3.bf16.msra.mxu0 %v461_v3  ;;  %434 = vmatpush3.bf16.msra.mxu1 %v469_v8 }
  0x43   :  { %415 = vmatprep.subr.bf16.mxu0 %v580_v0  ;;  %435 = vmatprep.subr.bf16.mxu1 %v580_v0 }
  0x46   :  { %416 = vmatpush3.bf16.msra.mxu0 %v462_v5  ;;  %436 = vmatpush3.bf16.msra.mxu1 %v470_v10 }
  0x47   :  { %417 = vmatprep.subr.bf16.mxu0 %v580_v0  ;;  %437 = vmatprep.subr.bf16.mxu1 %v580_v0 }
  0x4a   :  { %418 = vmatpush3.bf16.msra.mxu0 %v463_v7  ;;  %438 = vmatpush3.bf16.msra.mxu1 %v471_v12 }
  0x4b   :  { %419 = vmatprep.subr.bf16.mxu0 %v580_v0  ;;  %439 = vmatprep.subr.bf16.mxu1 %v580_v0 }
  0x4e   :  { %420 = vmatpush3.bf16.msra.mxu0 %v464_v9  ;;  %440 = vmatpush3.bf16.msra.mxu1 %v472_v16 }
  0x4f   :  { %421 = vmatprep.subr.bf16.mxu0 %v580_v0  ;;  %441 = vmatprep.subr.bf16.mxu1 %v580_v0 }
  0x52   :  { %422 = vmatpush3.bf16.msra.mxu0 %v465_v11  ;;  %442 = vmatpush3.bf16.msra.mxu1 %v473_v18 }
  0x53   :  { %423 = vmatprep.subr.bf16.mxu0 %v580_v0  ;;  %443 = vmatprep.subr.bf16.mxu1 %v580_v0 }
  0x56   :  { %424 = vmatpush3.bf16.msra.mxu0 %v466_v13  ;;  %444 = vmatpush3.bf16.msra.mxu1 %v474_v19 }
  0x59   :  { %426 = vmatmul.mubr.bf16.vlgmr.msra.gmra.mrb[0].mxu0 %v71_v17 }
 0x12c   :  { %v177_v21 = vpop.f32.mrb[0].mxu0 }
 0x12d   :  { %v178_v22 = vadd.f32 %v370_v20, %v177_v21  ;;  %v427_v23 = vpop.f32.mrb[1].mxu0 }
 0x12e   :  { %v180_v24 = vpop.f32.mrb[2].mxu0 }
 0x12f   :  { %v181_v25 = vadd.f32 %v370_v20, %v180_v24  ;;  %v428_v26 = vpop.f32.mrb[3].mxu0  ;;  %v184_v27 = vmax.f32 %v178_v22, 0.0 }
 0x131   :  { %v185_v28 = vmax.f32 %v181_v25, 0.0 }
 0x133   :  { %v186_v29 = vpack.c.bf16 %v185_v28, %v184_v27 }
 0x135   :  { %446 = vmatmul.mubr.bf16.vlgmr.msra.gmra.mrb[0].mxu1 %v186_v29 }
 0x208   :  { %v292_v33 = vpop.f32.mrb[0].mxu1 }
 0x209   :  { %v293_v34 = vadd.f32 %v379_v32, %v292_v33  ;;  %v447_v35 = vpop.f32.mrb[1].mxu1 }
 0x20a   :  { %v295_v36 = vpop.f32.mrb[2].mxu1 }
 0x20b   :  { %v296_v38 = vadd.f32 %v379_v32, %v295_v36  ;;  %v448_v39 = vpop.f32.mrb[3].mxu1  ;;  %v299_v40 = vadd.f32 %v293_v34, %v69_v14 }
 0x20d   :  { %v300_v41 = vadd.f32 %v296_v38, %v70_v15  ;;  %v306_v42 = vmul.f32 %v388_v37, %v299_v40 }
 0x20f   :  { %308 = vadd.xlane.f32.xlu0 %v306_v42  ;;  %v307_v43 = vmul.f32 %v388_v37, %v300_v41 }
 0x213   :  { %310 = vadd.xlane.f32.xlu0 %v307_v43 }
 0x29c   :  { %v309_v44 = vpop.xlane.xlu0 %308 }
 0x29d   :  { %v312_v45 = vmul.f32 0.03125, %v309_v44 }
 0x29f   :  { %v314_v46 = vsub.f32 %v299_v40, %v312_v45 }
 0x2a0   :  { %v311_v47 = vpop.xlane.xlu0 %310 }
 0x2a1   :  { %v313_v48 = vmul.f32 0.03125, %v311_v47  ;;  %v316_v49 = vmul.f32 %v388_v37, %v314_v46 }
 0x2a3   :  { %v315_v50 = vsub.f32 %v300_v41, %v313_v48  ;;  %v318_v51 = vmul.f32 %v316_v49, %v316_v49 }
 0x2a5   :  { %320 = vadd.xlane.f32.xlu1 %v318_v51  ;;  %v317_v52 = vmul.f32 %v388_v37, %v315_v50 }
 0x2a7   :  { %v319_v53 = vmul.f32 %v317_v52, %v317_v52 }
 0x2a9   :  { %322 = vadd.xlane.f32.xlu1 %v319_v53 }
 0x332   :  { %v321_v54 = vpop.xlane.xlu1 %320 }
 0x333   :  { %v324_v55 = vmul.f32 0.03125, %v321_v54 }
 0x335   :  { %v326_v56 = vadd.f32 1e-05, %v324_v55 }
 0x336   :  { %v323_v57 = vpop.xlane.xlu1 %322 }
 0x337   :  { %475 = vrsqrt.f32 %v326_v56  ;;  %v325_v58 = vmul.f32 0.03125, %v323_v57 }
 0x339   :  { %v327_v59 = vadd.f32 1e-05, %v325_v58 }
 0x33b   :  { %477 = vrsqrt.f32 %v327_v59 }
 0x341   :  { %v476_v60 = vpop.eup %475 }
 0x342   :  { %v330_v62 = vmul.f32 %v476_v60, %v316_v49 }
 0x344   :  { %v339_v0 = vmul.f32 %v389_v61, %v330_v62 }
 0x345   :  { %v478_v1 = vpop.eup %477 }
 0x346   :  { %v331_v2 = vmul.f32 %v478_v1, %v317_v52  ;;  %v348_v3 = vadd.f32 %v390_v63, %v339_v0 }
 0x348   :  { %v340_v4 = vmul.f32 %v389_v61, %v331_v2  ;;  %350 = vst [vmem:[#allocation8] sm:$0xff] %v348_v3 }
 0x34a   :  { %v349_v5 = vadd.f32 %v390_v63, %v340_v4 }
 0x34c   :  { %351 = vst [vmem:[#allocation8 + $0x8] sm:$0xff] %v349_v5 }
 0x34d   :  { %556 = shalt.err (!%p553_p0)
}
 0x34e   :  { %s557_s24 = scalar_lea.hbm %s721_s7, 256 }
 0x34f   :  { %p558_p1 = scmp.ne.s32.totalorder %s721_s7, %s557_s24  ;;  %p561_p2 = scmp.lt.u32.totalorder %s557_s24, %s721_s7 }
 0x351   :  { %p563_p3 = pnand %p561_p2, %p558_p1 }
 0x353   :  { %566 = shalt.err (!%p563_p3)
}
 0x354   :  { %363 = dma.vmem_to_hbm [thread:$0]  %s358_s22, 256, %s721_s7, [#allocation4], %s577_s1, %s577_s1, %s578_s25  }
 0x355   :  { %571 = dma.done.wait [#allocation4], 256  }
 0x356   :  { %572 = vsyncadd [#allocation4], 4294967040 }
 0x357   :  { %367 = vsyncpa [#allocation3], 1 }
 0x358   :  { %368 = vsyncpa [#allocation6], 1 }
 0x359   :  { %369 = vsyncpa [#allocation4], 1 }

</bundles_post_ra>
